<compile_context>
chip_gen: v7x
topology: tpu7x:2x2x1
jax: 0.10.0
libtpu: 0.0.40
codegen_flags: <defaults>
</compile_context>

<pallas_src>
import functools
import math

import jax
import jax.numpy as jnp
from jax.experimental import pallas as pl
from jax.experimental.pallas import tpu as pltpu

MATMUL_PRECISION = None  # set to jax.lax.Precision.HIGHEST for f32-exact matmuls


# ---------------------------------------------------------------------------
# Hardware / budget helpers
# ---------------------------------------------------------------------------
def _num_tensorcores():
    """Best-effort TensorCore count per device; conservative default = 1."""
    try:
        dev = jax.devices()[0]
    except Exception:
        return 1
    nc = getattr(dev, "num_cores", None)
    if isinstance(nc, int) and nc >= 1:
        return nc
    kind = str(getattr(dev, "device_kind", "")).lower()
    if "lite" in kind or "v5e" in kind or "v6e" in kind or "v6" in kind:
        return 1
    for tag in ("v7", "v5p", "v4", "v5"):
        if tag in kind:
            return 2
    return 1


def _vmem_budget_bytes():
    """~70% of physical VMEM, capped; safe fallback if query unavailable."""
    cap = None
    try:
        info = pltpu.get_tpu_info()
        cap = getattr(info, "vmem_capacity_bytes", None)
    except Exception:
        cap = None
    if not cap:
        cap = 64 * 1024 * 1024          # conservative (v7x per-TC physical)
    return int(min(int(cap) * 7 // 10, 100 * 1024 * 1024))


def _batch_block(B, num_cores):
    """Split B across TensorCores only when there are >= 2 of them."""
    if num_cores >= 2 and B % 16 == 0:
        return B // 2
    return B


def _time_block(T, tb, G, H, *, xg_bytes, out_bytes, w_bytes, budget,
                with_mask, max_tt=64):
    """Largest divisor of T (<= max_tt) whose block working set fits VMEM."""
    fixed = 2 * H * G * w_bytes            # W_hh (worst case double-buffered)
    fixed += 2 * tb * H * 4                # h/c f32 scratch
    fixed += 4 * tb * H * out_bytes        # h0/c0 input blocks
    fixed += 4 * tb * H * out_bytes        # h_n/c_n output blocks
    best = 1
    for tt in range(1, min(T, max_tt) + 1):
        if T % tt:
            continue
        per = tt * tb * (2 * G * xg_bytes + 2 * H * out_bytes)
        if with_mask:
            per += tt * tb * H * 4         # mask scratch
        if fixed + per <= int(budget * 0.8):
            best = tt
    return best


def _row_block_and_pad(rows, cap=512):
    """Row block for the input projection; pad rows when no nice divisor."""
    if rows <= cap:
        return rows, rows
    for d in range(cap - cap % 8, 0, -8):
        if rows % d == 0:
            return d, rows
    rb = 256
    padded = ((rows + rb - 1) // rb) * rb
    return rb, padded


def _col_block(G, D, rb, w_bytes, xg_bytes, x_bytes, budget):
    """Tile the 4H dimension when weight + tiles exceed the VMEM budget."""
    def usage(gb):
        return 2 * (D * gb * w_bytes + rb * gb * xg_bytes + rb * D * x_bytes) + 4 * gb
    if usage(G) <= int(budget * 0.8):
        return G
    for gb in range(G, 0, -1):
        if G % gb:
            continue
        if gb != G and gb % 128:
            continue
        if usage(gb) <= int(budget * 0.8):
            return gb
    return G


def _mix32(x):
    """lowbias32-style int32 mixer; logical right shifts emulated with masks."""
    def lsr(v, k):
        return jnp.right_shift(v, k) & jnp.int32((1 << (32 - k)) - 1)
    x = x ^ lsr(x, 16)
    x = x * jnp.int32(0x7FEB352D)
    x = x ^ lsr(x, 15)
    x = x * jnp.int32(-2073254261)          # 0x846CA68B as signed int32
    x = x ^ lsr(x, 16)
    return x


def _sigmoid(x):
    # EUP-friendly form: sigmoid(x) = 0.5 * tanh(0.5 * x) + 0.5
    return 0.5 * jnp.tanh(0.5 * x) + 0.5


# ---------------------------------------------------------------------------
# Kernel 1: hoisted input projection  xg = x @ W_ih^T + (b_ih + b_hh)
# ---------------------------------------------------------------------------
def _input_proj_kernel(x_ref, w_ref, b_ref, o_ref):
    o_ref[...] = (jnp.dot(x_ref[...], w_ref[...],
                          preferred_element_type=jnp.float32,
                          precision=MATMUL_PRECISION)
                  + b_ref[...].astype(jnp.float32)).astype(o_ref.dtype)


def input_projection(x, w_ih_t, b, *, budget):
    """x: (T,B,D), w_ih_t: (D,4H), b: (1,4H) -> (T,B,4H) pre-gates (param dtype)."""
    T, B, D = x.shape
    G = w_ih_t.shape[1]
    xg_dtype = jnp.bfloat16 if w_ih_t.dtype == jnp.bfloat16 else jnp.float32
    rows = T * B
    rb, padded_rows = _row_block_and_pad(rows)
    x2 = x.reshape(rows, D)
    if padded_rows != rows:
        x2 = jnp.pad(x2, ((0, padded_rows - rows), (0, 0)))
    gb = _col_block(G, D, rb,
                    w_ih_t.dtype.itemsize, jnp.dtype(xg_dtype).itemsize,
                    x2.dtype.itemsize, budget)
    grid = (padded_rows // rb, G // gb)
    y2 = pl.pallas_call(
        _input_proj_kernel,
        out_shape=jax.ShapeDtypeStruct((padded_rows, G), xg_dtype),
        grid_spec=pltpu.PrefetchScalarGridSpec(
            num_scalar_prefetch=0,
            grid=grid,
            in_specs=[
                pl.BlockSpec((rb, D), lambda r, g: (r, 0)),
                pl.BlockSpec((D, gb), lambda r, g: (0, g)),
                pl.BlockSpec((1, gb), lambda r, g: (0, g)),
            ],
            out_specs=pl.BlockSpec((rb, gb), lambda r, g: (r, g)),
        ),
        compiler_params=pltpu.CompilerParams(
            dimension_semantics=("parallel", "parallel"),
            vmem_limit_bytes=budget),
    )(x2, w_ih_t, b)
    if padded_rows != rows:
        y2 = y2[:rows]
    return y2.reshape(T, B, G)


# ---------------------------------------------------------------------------
# Kernel 2: LSTM recurrence over time blocks, dropout fused into the y write.
# ---------------------------------------------------------------------------
def _lstm_recurrence_kernel(seed_ref, xg_ref, h0_ref, c0_ref, whh_ref,
                            y_ref, hN_ref, cN_ref, h_sc, c_sc, *extra,
                            tt, rate, apply_dropout, total_b):
    bb = pl.program_id(0)               # batch tile  ("parallel")
    t_blk = pl.program_id(1)            # time block  ("arbitrary", sequential)
    n_t_blk = pl.num_programs(1)
    TB, H = h_sc.shape

    @pl.when(t_blk == 0)
    def _():
        h_sc[...] = h0_ref[...].astype(jnp.float32)
        c_sc[...] = c0_ref[...].astype(jnp.float32)

    whh = whh_ref[...]                  # (H, 4H) in param dtype (bf16 stays bf16)

    if apply_dropout:
        # Block-level mask generation (hoisted off the serial h->c chain):
        # one lowbias32 hash per (t, b, h) element of the whole time block.
        mask_sc = extra[0]              # (tt, TB, H) f32: scale (keep) or 0 (drop)
        seed = seed_ref[0]
        keep_thresh = jnp.int32(min(int(round(rate * (1 << 24))), (1 << 24) - 1))
        scale = jnp.float32(1.0 / (1.0 - rate))
        t_idx = jax.lax.broadcasted_iota(jnp.int32, (tt, TB, H), 0) + t_blk * tt
        b_idx = jax.lax.broadcasted_iota(jnp.int32, (tt, TB, H), 1) + bb * TB
        h_idx = jax.lax.broadcasted_iota(jnp.int32, (tt, TB, H), 2)
        idx = (t_idx * jnp.int32(total_b) + b_idx) * jnp.int32(H) + h_idx
        bits = _mix32(idx ^ (seed * jnp.int32(-1640531535)))
        bits24 = jnp.right_shift(bits, 8) & jnp.int32((1 << 24) - 1)
        mask_sc[...] = jnp.where(bits24 >= keep_thresh, scale, jnp.float32(0.0))

    def step(k, carry):
        h, c = carry
        gates = xg_ref[k].astype(jnp.float32) + jnp.dot(
            h.astype(whh.dtype), whh, preferred_element_type=jnp.float32,
            precision=MATMUL_PRECISION)
        # PyTorch gate order i, f, g, o.  For production sizes make H a
        # multiple of 128 so these slices fall on lane-tile boundaries.
        i_g = _sigmoid(gates[:, 0 * H:1 * H])
        f_g = _sigmoid(gates[:, 1 * H:2 * H])
        g_g = jnp.tanh(gates[:, 2 * H:3 * H])
        o_g = _sigmoid(gates[:, 3 * H:4 * H])
        c = f_g * c + i_g * g_g
        h = o_g * jnp.tanh(c)
        if apply_dropout:
            y_ref[k] = (h * mask_sc[k]).astype(y_ref.dtype)
        else:
            y_ref[k] = h.astype(y_ref.dtype)
        return (h, c)

    h, c = jax.lax.fori_loop(0, tt, step, (h_sc[...], c_sc[...]),
                             unroll=min(tt, 2))
    h_sc[...] = h
    c_sc[...] = c

    @pl.when(t_blk == n_t_blk - 1)      # store h_n / c_n only once
    def _():
        hN_ref[...] = h.astype(hN_ref.dtype)
        cN_ref[...] = c.astype(cN_ref.dtype)


def lstm_recurrence(xg, h0, c0, w_hh_t, *, out_dtype, rate, apply_dropout,
                    seed, num_cores, budget):
    """xg: (T,B,4H) pre-gates, h0/c0: (B,H), w_hh_t: (H,4H)."""
    T, B, G = xg.shape
    H = w_hh_t.shape[0]
    tb = _batch_block(B, num_cores)
    tt = _time_block(T, tb, G, H,
                     xg_bytes=xg.dtype.itemsize,
                     out_bytes=jnp.dtype(out_dtype).itemsize,
                     w_bytes=w_hh_t.dtype.itemsize,
                     budget=budget, with_mask=apply_dropout)
    grid = (B // tb, T // tt)

    kernel = functools.partial(
        _lstm_recurrence_kernel, tt=tt, rate=float(rate),
        apply_dropout=bool(apply_dropout), total_b=B)
    seed_arr = jnp.asarray([int(seed)], jnp.int32)

    out_shape = (jax.ShapeDtypeStruct((T, B, H), out_dtype),
                 jax.ShapeDtypeStruct((B, H), out_dtype),
                 jax.ShapeDtypeStruct((B, H), out_dtype))

    scratch = [pltpu.VMEM((tb, H), jnp.float32),
               pltpu.VMEM((tb, H), jnp.float32)]
    if apply_dropout:
        scratch.append(pltpu.VMEM((tt, tb, H), jnp.float32))

    y, hN, cN = pl.pallas_call(
        kernel,
        out_shape=out_shape,
        grid_spec=pltpu.PrefetchScalarGridSpec(
            num_scalar_prefetch=1,
            grid=grid,
            in_specs=[
                pl.BlockSpec((tt, tb, G), lambda bi, ti, s: (ti, bi, 0)),  # xg
                pl.BlockSpec((tb, H), lambda bi, ti, s: (bi, 0)),          # h0
                pl.BlockSpec((tb, H), lambda bi, ti, s: (bi, 0)),          # c0
                pl.BlockSpec((H, G), lambda bi, ti, s: (0, 0)),            # W_hh^T
            ],
            out_specs=(
                pl.BlockSpec((tt, tb, H), lambda bi, ti, s: (ti, bi, 0)),  # y
                pl.BlockSpec((tb, H), lambda bi, ti, s: (bi, 0)),          # h_n
                pl.BlockSpec((tb, H), lambda bi, ti, s: (bi, 0)),          # c_n
            ),
            scratch_shapes=scratch,
        ),
        compiler_params=pltpu.CompilerParams(
            dimension_semantics=("parallel", "arbitrary"),
            vmem_limit_bytes=budget),
    )(seed_arr, xg, h0, c0, w_hh_t)
    return y, hN, cN


# ---------------------------------------------------------------------------
# Module-level forward: stacked LSTM, inter-layer dropout fused into layers
# 0..L-2, trailing nn.Dropout fused into the last layer's output write.
# ---------------------------------------------------------------------------
def lstm_with_dropout_forward(prev_output, params, prev_state=None, *,
                              dropout_rate=0.1, training=True, seed=0):
    T, B, _ = prev_output.shape
    L = len(params)
    H = params[0]["w_hh_t"].shape[0]
    dtype = prev_output.dtype
    rate = 0.0 if dropout_rate is None else float(dropout_rate)

    if prev_state is None:
        h0 = jnp.zeros((L, B, H), dtype)
        c0 = jnp.zeros((L, B, H), dtype)
    else:
        h0, c0 = prev_state

    apply_do = bool(training) and rate > 0.0
    num_cores = _num_tensorcores()
    budget = _vmem_budget_bytes()

    out = prev_output
    h_finals, c_finals = [], []
    for l in range(L):
        p = params[l]
        xg = input_projection(out, p["w_ih_t"], p["b"], budget=budget)
        out, hN, cN = lstm_recurrence(
            xg, h0[l], c0[l], p["w_hh_t"], out_dtype=dtype, rate=rate,
            apply_dropout=apply_do, seed=int(seed) + 1000003 * (l + 1),
            num_cores=num_cores, budget=budget)
        h_finals.append(hN)
        c_finals.append(cN)

    return out, (jnp.stack(h_finals), jnp.stack(c_finals))


# ---------------------------------------------------------------------------
# Deterministic parameter init (PyTorch LSTM default: U(-1/sqrt(H), 1/sqrt(H))).
# ---------------------------------------------------------------------------
def init_lstm_params(key, input_size, hidden_size, num_layers, dtype=jnp.float32):
    k = 1.0 / math.sqrt(hidden_size)
    params = []
    for l in range(num_layers):
        d_in = input_size if l == 0 else hidden_size
        key, k1, k2, k3, k4 = jax.random.split(key, 5)
        w_ih = jax.random.uniform(k1, (4 * hidden_size, d_in), dtype, -k, k)
        w_hh = jax.random.uniform(k2, (4 * hidden_size, hidden_size), dtype, -k, k)
        b_ih = jax.random.uniform(k3, (4 * hidden_size,), dtype, -k, k)
        b_hh = jax.random.uniform(k4, (4 * hidden_size,), dtype, -k, k)
        params.append({
            "w_ih_t": w_ih.T,                       # (D_in, 4H)
            "w_hh_t": w_hh.T,                       # (H, 4H)
            "b": (b_ih + b_hh).reshape(1, -1),      # (1, 4H)
        })
    return params


# Pure-JAX reference (eval mode, no dropout) to validate the Pallas recurrence.
def _ref_lstm(x, params, h0, c0):
    out = x
    hs, cs = [], []
    for l, p in enumerate(params):
        w_ih_t, w_hh_t, b = p["w_ih_t"], p["w_hh_t"], p["b"]

        def step(carry, xt, w_ih_t=w_ih_t, w_hh_t=w_hh_t, b=b):
            h, c = carry
            gates = xt @ w_ih_t + h @ w_hh_t + b[0]
            i, f, g, o = jnp.split(gates, 4, axis=-1)
            i, f, o = jax.nn.sigmoid(i), jax.nn.sigmoid(f), jax.nn.sigmoid(o)
            g = jnp.tanh(g)
            c = f * c + i * g
            h = o * jnp.tanh(c)
            return (h, c), h

        (hN, cN), ys = jax.lax.scan(step, (h0[l], c0[l]), out)
        out = ys
        hs.append(hN)
        cs.append(cN)
    return out, (jnp.stack(hs), jnp.stack(cs))


if __name__ == "__main__":
    # Small shapes: T=8, B=4, input_size=16, hidden_size=32, num_layers=2.
    T, B, INPUT, HIDDEN, LAYERS = 8, 4, 16, 32, 2
    DROPOUT = 0.1

    key = jax.random.PRNGKey(0)
    key, kx, kh, kc, kp = jax.random.split(key, 5)
    x = jax.random.normal(kx, (T, B, INPUT), jnp.float32)
    h0 = jax.random.normal(kh, (LAYERS, B, HIDDEN), jnp.float32)
    c0 = jax.random.normal(kc, (LAYERS, B, HIDDEN), jnp.float32)
    params = init_lstm_params(kp, INPUT, HIDDEN, LAYERS)

    # --- eval mode (dropout = identity): compare against pure-JAX reference.
    y_eval, (hN, cN) = lstm_with_dropout_forward(
        x, params, (h0, c0), dropout_rate=DROPOUT, training=False)
    y_ref, (hN_ref, cN_ref) = _ref_lstm(x, params, h0, c0)
    jax.block_until_ready((y_eval, hN, cN))
    # Loose tolerance: TPU f32 matmuls default to bf16 MXU passes.
    assert jnp.allclose(y_eval, y_ref, atol=2e-2, rtol=2e-2)
    assert jnp.allclose(hN, hN_ref, atol=2e-2, rtol=2e-2)
    assert jnp.allclose(cN, cN_ref, atol=2e-2, rtol=2e-2)

    # --- training mode: fused inter-layer + trailing dropout.
    y_tr, (hN_tr, cN_tr) = lstm_with_dropout_forward(
        x, params, (h0, c0), dropout_rate=DROPOUT, training=True, seed=1234)
    jax.block_until_ready((y_tr, hN_tr, cN_tr))
    assert y_tr.shape == (T, B, HIDDEN)
    assert hN_tr.shape == (LAYERS, B, HIDDEN) and cN_tr.shape == (LAYERS, B, HIDDEN)
    assert bool(jnp.all(jnp.isfinite(y_tr)))
    assert bool(jnp.all(jnp.isfinite(hN_tr))) and bool(jnp.all(jnp.isfinite(cN_tr)))
    # Trailing dropout zeroes ~DROPOUT of the output elements.
    zero_frac = float(jnp.mean((y_tr == 0.0).astype(jnp.float32)))
    assert 0.02 <= zero_frac <= 0.25, zero_frac

    # --- bf16 params/activations: xg stored bf16, matmul operands stay bf16.
    xb = x.astype(jnp.bfloat16)
    pb = [{k_: v.astype(jnp.bfloat16) for k_, v in p.items()} for p in params]
    y_bf, _ = lstm_with_dropout_forward(
        xb, pb, (h0.astype(jnp.bfloat16), c0.astype(jnp.bfloat16)),
        dropout_rate=DROPOUT, training=False)
    jax.block_until_ready(y_bf)
    assert y_bf.dtype == jnp.bfloat16 and y_bf.shape == (T, B, HIDDEN)
    assert jnp.allclose(y_bf.astype(jnp.float32), y_ref, atol=1e-1, rtol=1e-1)

    print("KERNEL_OK")
</pallas_src>

<mosaic_0001>
module attributes {stable_mosaic.version = 11 : i64} {
  func.func @_input_proj_kernel(%arg0: i32, %arg1: i32, %arg2: memref<32x16xf32, #tpu.memory_space<vmem>>, %arg3: memref<16x128xf32, #tpu.memory_space<vmem>>, %arg4: memref<1x128xf32, #tpu.memory_space<vmem>>, %arg5: memref<32x128xf32, #tpu.memory_space<vmem>>) attributes {dimension_semantics = [#tpu.dimension_semantics<parallel>, #tpu.dimension_semantics<parallel>], iteration_bounds = array<i64: 1, 1>, scalar_prefetch = 0 : i64, scratch_operands = 0 : i64, tpu.core_type = #tpu.core_type<tc>, window_params = [{transform_indices = @transform_0, window_bounds = array<i64: 32, 16>}, {transform_indices = @transform_1, window_bounds = array<i64: 16, 128>}, {transform_indices = @transform_2, window_bounds = array<i64: 1, 128>}, {transform_indices = @transform_3, window_bounds = array<i64: 32, 128>}]} {
    %c0 = arith.constant 0 : index
    %c0_0 = arith.constant 0 : index
    %0 = vector.load %arg2[%c0, %c0_0] : memref<32x16xf32, #tpu.memory_space<vmem>>, vector<32x16xf32>
    %c0_1 = arith.constant 0 : index
    %c0_2 = arith.constant 0 : index
    %1 = vector.load %arg3[%c0_1, %c0_2] : memref<16x128xf32, #tpu.memory_space<vmem>>, vector<16x128xf32>
    %cst = arith.constant dense<0.000000e+00> : vector<32x128xf32>
    %2 = tpu.matmul %0, %1, %cst {dimension_numbers = #tpu.dot_dimension_numbers<[1], [0], [0], [1], [0, 0, 1, 1], [], []>} : vector<32x16xf32>, vector<16x128xf32>, vector<32x128xf32> -> vector<32x128xf32>
    %c0_3 = arith.constant 0 : index
    %c0_4 = arith.constant 0 : index
    %3 = vector.load %arg4[%c0_3, %c0_4] : memref<1x128xf32, #tpu.memory_space<vmem>>, vector<1x128xf32>
    %4 = vector.broadcast %3 : vector<1x128xf32> to vector<32x128xf32>
    %5 = arith.addf %2, %4 : vector<32x128xf32>
    %c0_5 = arith.constant 0 : index
    %c0_6 = arith.constant 0 : index
    %6 = vector.load %arg5[%c0_5, %c0_6] : memref<32x128xf32, #tpu.memory_space<vmem>>, vector<32x128xf32>
    tpu.vector_store %arg5[%c0_5, %c0_6], %5 {strides = array<i32>} : memref<32x128xf32, #tpu.memory_space<vmem>>, vector<32x128xf32>,
    return
  }
  func.func @transform_0(%arg0: i32, %arg1: i32) -> (i32, i32) {
    %c0_i32 = arith.constant 0 : i32
    %c0_i32_0 = arith.constant 0 : i32
    return %arg0, %c0_i32 : i32, i32
  }
  func.func @transform_1(%arg0: i32, %arg1: i32) -> (i32, i32) {
    %c0_i32 = arith.constant 0 : i32
    %c0_i32_0 = arith.constant 0 : i32
    return %c0_i32, %arg1 : i32, i32
  }
  func.func @transform_2(%arg0: i32, %arg1: i32) -> (i32, i32) {
    %c0_i32 = arith.constant 0 : i32
    %c0_i32_0 = arith.constant 0 : i32
    return %c0_i32, %arg1 : i32, i32
  }
  func.func @transform_3(%arg0: i32, %arg1: i32) -> (i32, i32) {
    %c0_i32 = arith.constant 0 : i32
    return %arg0, %arg1 : i32, i32
  }
}

</mosaic_0001>

<bundles_post_ra>
// kernel: tpu_custom_call.1
= control target key start
LH: loop header
LB: loop body
LE: loop exit
PB: predicated region body
PF: predicated region fallthrough
CT: control target
= control target key end

     0   :  { %vm28_vm0 = vcmask 130048   ;;  %s256_s0 = inlined_call_operand.vmem [shape: f32[32,16], index: 0, kind: input, shape index: {}]   ;;  %s257_s1 = inlined_call_operand.vmem [shape: f32[16,128], index: 1, kind: input, shape index: {}]   ;;  %s258_s2 = inlined_call_operand.vmem [shape: f32[1,128], index: 2, kind: input, shape index: {}]   ;;  %s259_s3 = inlined_call_operand.hbm [shape: f32[32,128], index: 3, kind: output, shape index: {}]  }
   0x1   :  { %v19_v0 = vld [vmem:[%s257_s1] sm:$0xff]  ;;  %v20_v1 = vld [vmem:[%s257_s1 + $0x8] sm:$0xff]  ;;  %v17_v4 = vld [vmem:[%s256_s0 + $0x10] sm:$0xff] }
   0x2   :  { %v15_v2 = vld [vmem:[%s256_s0] sm:$0xff]  ;;  %v167_v3 = vpack.c.bf16 %v20_v1, %v19_v0  ;;  %164 = vmatprep.mubr.msk.f32.mxu1 %vm28_vm0, %v17_v4 }
   0x3   :  { %161 = vmatprep.mubr.msk.f32.mxu0 %vm28_vm0, %v15_v2 }
   0x4   :  { %8 = vsyncpa [#allocation3], 0  ;;  %168 = vmatprep.subr.bf16.mxu0 %v167_v3  ;;  %171 = vmatprep.subr.bf16.mxu1 %v167_v3  ;;  %v16_v5 = vld [vmem:[%s256_s0 + $0x8] sm:$0xff]  ;;  %v18_v6 = vld [vmem:[%s256_s0 + $0x18] sm:$0xff]  ;;  %s200_s25 = smov [#allocation2]  }
   0x5   :  { %170 = vmatpush3.bf16.msra.mxu0 %v167_v3  ;;  %172 = vmatpush3.bf16.msra.mxu1 %v167_v3  ;;  %v146_v7 = vld [vmem:[%s258_s2] ss:$0 sm:$0xff]  ;;  %s135_s26 = sshll.u32 %s200_s25, 4  ;;  %s136_s26 = int_to_ptr.vmem [resolvable:$true] %s135_s26 }
   0x6   :  { %s176_s0 = scalar_lea.vmem %s136_s26, 512  ;;  %p181_p1 = scmp.lt.s32.totalorder %s136_s26, %s136_s26 }
   0x7   :  { %p177_p0 = scmp.ne.s32.totalorder %s136_s26, %s176_s0  ;;  %p182_p2 = scmp.lt.s32.totalorder %s176_s0, %s176_s0 }
   0x8   :  { %162 = vmatmul.mubr.msk.f32.vlgmr.msra.gmra.mrb[0].mxu0 %vm28_vm0, %v16_v5  ;;  %165 = vmatmul.mubr.msk.f32.vlgmr.msra.gmra.mrb[0].mxu1 %vm28_vm0, %v18_v6 }
   0x9   :  { %p183_p3 = por %p182_p2, %p181_p1 }
   0xb   :  { %p184_p4 = pnand %p183_p3, %p177_p0 }
  0xdb   :  { %v163_v8 = vpop.f32.mrb[0].mxu0  ;;  %v166_v9 = vpop.f32.mrb[0].mxu1 }
  0xdc   :  { %v113_v10 = vadd.f32 %v163_v8, %v146_v7  ;;  %v123_v11 = vadd.f32 %v166_v9, %v146_v7  ;;  %v107_v12 = vpop.f32.mrb[1].mxu0  ;;  %v117_v13 = vpop.f32.mrb[1].mxu1 }
  0xdd   :  { %v108_v14 = vadd.f32 %v146_v7, %v107_v12  ;;  %v118_v15 = vadd.f32 %v146_v7, %v117_v13 }
  0xde   :  { %127 = vst [vmem:[#allocation2 + $0x8] sm:$0xff] %v113_v10  ;;  %129 = vst [vmem:[#allocation2 + $0x18] sm:$0xff] %v123_v11 }
  0xdf   :  { %126 = vst [vmem:[#allocation2] sm:$0xff] %v108_v14  ;;  %128 = vst [vmem:[#allocation2 + $0x10] sm:$0xff] %v118_v15 }
  0xe0   :  { %187 = shalt.err (!%p184_p4)
}
  0xe1   :  { %s188_s28 = scalar_lea.hbm %s259_s3, 512 }
  0xe2   :  { %p189_p5 = scmp.ne.s32.totalorder %s259_s3, %s188_s28  ;;  %p192_p6 = scmp.lt.u32.totalorder %s188_s28, %s259_s3 }
  0xe4   :  { %p194_p7 = pnand %p192_p6, %p189_p5 }
  0xe6   :  { %197 = shalt.err (!%p194_p7)
}
  0xe7   :  { %s201_s6 = smov 128   ;;  %s202_s7 = smov 8  }
  0xe8   :  { %141 = dma.vmem_to_hbm [thread:$0]  %s136_s26, 512, %s259_s3, [#allocation3], %s201_s6, %s201_s6, %s202_s7  }
  0xe9   :  { %198 = dma.done.wait [#allocation3], 512  }
  0xea   :  { %199 = vsyncadd [#allocation3], 4294966784 }
  0xeb   :  { %145 = vsyncpa [#allocation3], 1 }

</bundles_post_ra>
